<compile_context>
chip_gen: v5e
topology: v5e:2x2
jax: 0.10.0
libtpu: 0.0.40
codegen_flags: <defaults>
</compile_context>

<pallas_src>
import jax
import jax.numpy as jnp
from jax.experimental import pallas as pl
from jax.experimental.pallas import tpu as pltpu


def _round_up(n, m):
    return ((n + m - 1) // m) * m


def _cdiv(a, b):
    return -(-a // b)


def _linear_sub_relu_kernel(x_ref, w_ref, b_ref, out_ref):
    """Fused Linear -> sub(0.25) -> relu, lane-dense (batch-on-lanes) layout.

    x_ref  : (IN, TB)     f32, batch on the 128-lane axis (streams per tile)
    w_ref  : (OUT, IN)    f32, PyTorch Linear layout, resident
    b_ref  : (OUT, 1)     f32, resident
    out_ref: (3*OUT, TB)  f32; rows [0:OUT]=v1, [OUT:2*OUT]=v2, [2*OUT:3*OUT]=v3
    """
    w = w_ref[...]
    b = b_ref[...]
    out_f, in_f = w.shape

    # K = IN (=4) contraction as unrolled VPU multiply-adds (no MXU push/pop
    # for a 4x8 dot; exact f32 math).
    acc = w[:, 0:1] * x_ref[0:1, :]
    for k in range(1, in_f):
        acc = acc + w[:, k:k + 1] * x_ref[k:k + 1, :]

    v1 = acc + b
    v2 = v1 - 0.25
    v3 = jnp.maximum(v2, 0.0)

    # Single fused writeback block; sublane offsets are multiples of 8.
    out_ref[0:out_f, :] = v1.astype(out_ref.dtype)
    out_ref[out_f:2 * out_f, :] = v2.astype(out_ref.dtype)
    out_ref[2 * out_f:3 * out_f, :] = v3.astype(out_ref.dtype)


def _plan_batch_tiling(B, *, max_tile_b=32768):
    """Pick (TB, B_pad, n_tiles).

    TB is a multiple of 128 and as large as possible (amortizes the ~0.35 us
    per-grid-step overhead) but capped at max_tile_b so the double-buffered
    VMEM footprint (~256*TB bytes) fits every generation's default scoped
    VMEM.  Tile count is made even when B is big enough so v7x's two
    TensorCores can split the grid; padding never exceeds one tile.
    """
    B128 = _round_up(max(B, 1), 128)
    n_tiles = _cdiv(B128, max_tile_b)
    if B128 >= 256 and n_tiles % 2 == 1:
        n_tiles += 1                      # even tile count -> 2-TC grid split (v7x)
    TB = _round_up(_cdiv(B128, n_tiles), 128)
    n_tiles = _cdiv(B128, TB)
    B_pad = n_tiles * TB
    return TB, B_pad, n_tiles


@jax.jit
def linear_sub_relu(x, weight, bias):
    """x: (B, IN) f32; weight: (OUT, IN) f32 (PyTorch layout); bias: (OUT,) f32.

    Returns (v1, v2, v3), each of shape (B, OUT), matching the PyTorch module.
    """
    B, IN = x.shape
    OUT, IN_w = weight.shape
    assert IN == IN_w and bias.shape == (OUT,)

    TB, B_pad, n_tiles = _plan_batch_tiling(B)

    # Lane-dense transposed layout: batch on the 128-lane axis.  Under the same
    # jit this pad+transpose fuses into one small copy (input is only IN*B f32).
    x_t = jnp.pad(x.T, ((0, 0), (0, B_pad - B)))
    b2 = bias.reshape(OUT, 1)

    itemsize = jnp.dtype(x.dtype).itemsize
    bytes_accessed = (
        IN * B_pad * itemsize            # x
        + OUT * IN * itemsize            # weight
        + OUT * itemsize                 # bias
        + 3 * OUT * B_pad * itemsize     # fused v1/v2/v3 writeback
    )
    # Double-buffered VMEM: x block (IN=4 rows pad to 8 sublanes) + fused output.
    vmem_needed = 2 * (8 * TB * itemsize) + 2 * (3 * OUT * TB * itemsize)
    vmem_limit = int(min(100 * 1024 * 1024, vmem_needed + (8 << 20)))

    out_t = pl.pallas_call(
        _linear_sub_relu_kernel,
        out_shape=jax.ShapeDtypeStruct((3 * OUT, B_pad), x.dtype),
        grid=(n_tiles,),
        in_specs=[
            pl.BlockSpec((IN, TB), lambda i: (0, i)),     # x tile (streams)
            pl.BlockSpec((OUT, IN), lambda i: (0, 0)),    # weight (resident)
            pl.BlockSpec((OUT, 1), lambda i: (0, 0)),     # bias   (resident)
        ],
        out_specs=pl.BlockSpec((3 * OUT, TB), lambda i: (0, i)),
        compiler_params=pltpu.CompilerParams(
            dimension_semantics=("parallel",),            # grid split across TCs (v7x)
            vmem_limit_bytes=vmem_limit,
        ),
        cost_estimate=pl.CostEstimate(
            flops=2 * B_pad * IN * OUT,
            transcendentals=0,
            bytes_accessed=int(bytes_accessed),
        ),
    )(x_t, weight, b2)

    # Slice off padding and restore the module's (B, OUT) layout.  Inside the
    # same jit these fuse with the consumer instead of standalone HBM passes.
    v1 = out_t[0 * OUT:1 * OUT, :B].T
    v2 = out_t[1 * OUT:2 * OUT, :B].T
    v3 = out_t[2 * OUT:3 * OUT, :B].T
    return v1, v2, v3


def _reference(x, weight, bias):
    # Exact f32 reference (avoids TPU default-precision matmul differences).
    v1 = (x[:, None, :] * weight[None, :, :]).sum(-1) + bias
    v2 = v1 - 0.25
    v3 = jnp.maximum(v2, 0.0)
    return v1, v2, v3


if __name__ == "__main__":
    key = jax.random.PRNGKey(0)
    kx, kw, kb, kx2 = jax.random.split(key, 4)

    B, IN, OUT = 8, 4, 8
    x = jax.random.normal(kx, (B, IN), dtype=jnp.float32)
    # Deterministic parameters (mimic torch.nn.Linear uniform bound 1/sqrt(IN)).
    bound = 1.0 / (IN ** 0.5)
    weight = jax.random.uniform(kw, (OUT, IN), minval=-bound, maxval=bound,
                                dtype=jnp.float32)
    bias = jax.random.uniform(kb, (OUT,), minval=-bound, maxval=bound,
                              dtype=jnp.float32)

    # Small-shape check (single 128-lane tile).
    v1, v2, v3 = linear_sub_relu(x, weight, bias)
    jax.block_until_ready((v1, v2, v3))
    r1, r2, r3 = _reference(x, weight, bias)
    assert v1.shape == (B, OUT) and v2.shape == (B, OUT) and v3.shape == (B, OUT)
    assert jnp.allclose(v1, r1, atol=1e-5)
    assert jnp.allclose(v2, r2, atol=1e-5)
    assert jnp.allclose(v3, r3, atol=1e-5)

    # Multi-tile check (exercises the batch grid, pipelining and tail padding).
    B2 = 777
    x2 = jax.random.normal(kx2, (B2, IN), dtype=jnp.float32)
    w1, w2, w3 = linear_sub_relu(x2, weight, bias)
    jax.block_until_ready((w1, w2, w3))
    s1, s2, s3 = _reference(x2, weight, bias)
    assert jnp.allclose(w1, s1, atol=1e-5)
    assert jnp.allclose(w2, s2, atol=1e-5)
    assert jnp.allclose(w3, s3, atol=1e-5)

    print("KERNEL_OK")
</pallas_src>

<mosaic_0001>
module attributes {stable_mosaic.version = 11 : i64} {
  func.func @_linear_sub_relu_kernel(%arg0: i32, %arg1: memref<4x128xf32, #tpu.memory_space<vmem>>, %arg2: memref<8x4xf32, #tpu.memory_space<vmem>>, %arg3: memref<8x1xf32, #tpu.memory_space<vmem>>, %arg4: memref<24x128xf32, #tpu.memory_space<vmem>>) attributes {dimension_semantics = [#tpu.dimension_semantics<parallel>], iteration_bounds = array<i64: 1>, scalar_prefetch = 0 : i64, scratch_operands = 0 : i64, tpu.core_type = #tpu.core_type<tc>, window_params = [{transform_indices = @transform_0, window_bounds = array<i64: 4, 128>}, {pipeline_mode = #tpu.pipeline_mode<synchronous>, transform_indices = @transform_1, window_bounds = array<i64: 8, 4>}, {pipeline_mode = #tpu.pipeline_mode<synchronous>, transform_indices = @transform_2, window_bounds = array<i64: 8, 1>}, {transform_indices = @transform_3, window_bounds = array<i64: 24, 128>}]} {
    %c0 = arith.constant 0 : index
    %c0_0 = arith.constant 0 : index
    %0 = vector.load %arg2[%c0, %c0_0] : memref<8x4xf32, #tpu.memory_space<vmem>>, vector<8x4xf32>
    %c0_1 = arith.constant 0 : index
    %c0_2 = arith.constant 0 : index
    %1 = vector.load %arg3[%c0_1, %c0_2] : memref<8x1xf32, #tpu.memory_space<vmem>>, vector<8x1xf32>
    %2 = vector.extract_strided_slice %0 {offsets = [0, 0], sizes = [8, 1], strides = [1, 1]} : vector<8x4xf32> to vector<8x1xf32>
    %c0_3 = arith.constant 0 : index
    %c0_4 = arith.constant 0 : index
    %3 = vector.load %arg1[%c0_3, %c0_4] : memref<4x128xf32, #tpu.memory_space<vmem>>, vector<1x128xf32>
    %4 = vector.broadcast %2 : vector<8x1xf32> to vector<8x128xf32>
    %5 = vector.broadcast %3 : vector<1x128xf32> to vector<8x128xf32>
    %6 = arith.mulf %4, %5 : vector<8x128xf32>
    %7 = vector.extract_strided_slice %0 {offsets = [0, 1], sizes = [8, 1], strides = [1, 1]} : vector<8x4xf32> to vector<8x1xf32>
    %c1 = arith.constant 1 : index
    %c0_5 = arith.constant 0 : index
    %8 = vector.load %arg1[%c1, %c0_5] : memref<4x128xf32, #tpu.memory_space<vmem>>, vector<1x128xf32>
    %9 = vector.broadcast %7 : vector<8x1xf32> to vector<8x128xf32>
    %10 = vector.broadcast %8 : vector<1x128xf32> to vector<8x128xf32>
    %11 = arith.mulf %9, %10 : vector<8x128xf32>
    %12 = arith.addf %6, %11 : vector<8x128xf32>
    %13 = vector.extract_strided_slice %0 {offsets = [0, 2], sizes = [8, 1], strides = [1, 1]} : vector<8x4xf32> to vector<8x1xf32>
    %c2 = arith.constant 2 : index
    %c0_6 = arith.constant 0 : index
    %14 = vector.load %arg1[%c2, %c0_6] : memref<4x128xf32, #tpu.memory_space<vmem>>, vector<1x128xf32>
    %15 = vector.broadcast %13 : vector<8x1xf32> to vector<8x128xf32>
    %16 = vector.broadcast %14 : vector<1x128xf32> to vector<8x128xf32>
    %17 = arith.mulf %15, %16 : vector<8x128xf32>
    %18 = arith.addf %12, %17 : vector<8x128xf32>
    %19 = vector.extract_strided_slice %0 {offsets = [0, 3], sizes = [8, 1], strides = [1, 1]} : vector<8x4xf32> to vector<8x1xf32>
    %c3 = arith.constant 3 : index
    %c0_7 = arith.constant 0 : index
    %20 = vector.load %arg1[%c3, %c0_7] : memref<4x128xf32, #tpu.memory_space<vmem>>, vector<1x128xf32>
    %21 = vector.broadcast %19 : vector<8x1xf32> to vector<8x128xf32>
    %22 = vector.broadcast %20 : vector<1x128xf32> to vector<8x128xf32>
    %23 = arith.mulf %21, %22 : vector<8x128xf32>
    %24 = arith.addf %18, %23 : vector<8x128xf32>
    %25 = vector.broadcast %1 : vector<8x1xf32> to vector<8x128xf32>
    %26 = arith.addf %24, %25 : vector<8x128xf32>
    %cst = arith.constant 2.500000e-01 : f32
    %27 = vector.broadcast %cst : f32 to vector<8x128xf32>
    %28 = arith.subf %26, %27 : vector<8x128xf32>
    %cst_8 = arith.constant 0.000000e+00 : f32
    %29 = vector.broadcast %cst_8 : f32 to vector<8x128xf32>
    %30 = arith.maximumf %28, %29 : vector<8x128xf32>
    %c0_9 = arith.constant 0 : index
    %c0_10 = arith.constant 0 : index
    %31 = vector.load %arg4[%c0_9, %c0_10] : memref<24x128xf32, #tpu.memory_space<vmem>>, vector<8x128xf32>
    tpu.vector_store %arg4[%c0_9, %c0_10], %26 {strides = array<i32>} : memref<24x128xf32, #tpu.memory_space<vmem>>, vector<8x128xf32>,
    %c8 = arith.constant 8 : index
    %c0_11 = arith.constant 0 : index
    %32 = vector.load %arg4[%c8, %c0_11] : memref<24x128xf32, #tpu.memory_space<vmem>>, vector<8x128xf32>
    tpu.vector_store %arg4[%c8, %c0_11], %28 {strides = array<i32>} : memref<24x128xf32, #tpu.memory_space<vmem>>, vector<8x128xf32>,
    %c16 = arith.constant 16 : index
    %c0_12 = arith.constant 0 : index
    %33 = vector.load %arg4[%c16, %c0_12] : memref<24x128xf32, #tpu.memory_space<vmem>>, vector<8x128xf32>
    tpu.vector_store %arg4[%c16, %c0_12], %30 {strides = array<i32>} : memref<24x128xf32, #tpu.memory_space<vmem>>, vector<8x128xf32>,
    return
  }
  func.func @transform_0(%arg0: i32) -> (i32, i32) {
    %c0_i32 = arith.constant 0 : i32
    %c0_i32_0 = arith.constant 0 : i32
    return %c0_i32, %arg0 : i32, i32
  }
  func.func @transform_1(%arg0: i32) -> (i32, i32) {
    %c0_i32 = arith.constant 0 : i32
    %c0_i32_0 = arith.constant 0 : i32
    %c0_i32_1 = arith.constant 0 : i32
    return %c0_i32, %c0_i32_0 : i32, i32
  }
  func.func @transform_2(%arg0: i32) -> (i32, i32) {
    %c0_i32 = arith.constant 0 : i32
    %c0_i32_0 = arith.constant 0 : i32
    %c0_i32_1 = arith.constant 0 : i32
    return %c0_i32, %c0_i32_0 : i32, i32
  }
  func.func @transform_3(%arg0: i32) -> (i32, i32) {
    %c0_i32 = arith.constant 0 : i32
    %c0_i32_0 = arith.constant 0 : i32
    return %c0_i32, %arg0 : i32, i32
  }
}

</mosaic_0001>

<bundles_post_ra>
// kernel: linear_sub_relu.1
= control target key start
LH: loop header
LB: loop body
LE: loop exit
PB: predicated region body
PF: predicated region fallthrough
CT: control target
= control target key end

     0   :  { %v78_v0 = vmov 0   ;;  %v79_v2 = vmov 2   ;;  %v80_v4 = vmov 1   ;;  %v81_v5 = vmov 3   ;;  %s129_s1 = inlined_call_operand.vmem [shape: f32[8,4], index: 1, kind: input, shape index: {}]   ;;  %s130_s2 = inlined_call_operand.vmem [shape: f32[8,1], index: 2, kind: input, shape index: {}]   ;;  %s131_s0 = inlined_call_operand.vmem [shape: f32[4,128], index: 0, kind: input, shape index: {}]   ;;  %s132_s3 = inlined_call_operand.vmem [shape: f32[24,128], index: 3, kind: output, shape index: {}]  }
   0x1   :  { %68 = vset.pattern.permute.xlu0 %v78_v0  ;;  %v14_v1 = vld [vmem:[%s129_s1] sm:$0xff]  ;;  %70 = vset.pattern.permute.xlu1 %v79_v2 }
   0x2   :  { %v15_v3 = vld [vmem:[%s130_s2] sm:$0xff]  ;;  %19 = vperm.xlu0 %68, %v14_v1   ;;  %34 = vperm.xlu1 %70, %v14_v1  }
   0x3   :  { %72 = vset.pattern.permute.xlu2 %v78_v0  ;;  %v74_v8 = vld [vmem:[%s131_s0] ss:$0 sm:$0xff]  ;;  %v76_v9 = vld [vmem:[%s131_s0 + $0x1] ss:$0 sm:$0xff]  ;;  %v75_v10 = vld [vmem:[%s131_s0 + $0x2] ss:$0 sm:$0xff] }
   0x4   :  { %50 = vperm.xlu2 %72, %v15_v3   ;;  %v77_v11 = vld [vmem:[%s131_s0 + $0x3] ss:$0 sm:$0xff] }
   0xa   :  { %69 = vset.pattern.permute.xlu0 %v80_v4  ;;  %71 = vset.pattern.permute.xlu1 %v81_v5 }
   0xb   :  { %26 = vperm.xlu0 %69, %v14_v1   ;;  %42 = vperm.xlu1 %71, %v14_v1  }
  0x13   :  { %73 = vset.pattern.permute.xlu0 %v78_v0 }
  0x5e   :  { %v51_v20 = vpop.permute.xlu2 %50 }
  0x74   :  { %v20_v6 = vpop.permute.xlu0 %19  ;;  %v35_v7 = vpop.permute.xlu1 %34 }
  0x75   :  { %v23_v14 = vmul.f32 %v74_v8, %v20_v6  ;;  %v38_v16 = vmul.f32 %v75_v10, %v35_v7 }
  0x7d   :  { %v27_v12 = vpop.permute.xlu0 %26  ;;  %v43_v13 = vpop.permute.xlu1 %42 }
  0x7e   :  { %v30_v15 = vmul.f32 %v76_v9, %v27_v12  ;;  %v46_v18 = vmul.f32 %v77_v11, %v43_v13 }
  0x80   :  { %v31_v17 = vadd.f32 %v30_v15, %v23_v14 }
  0x82   :  { %v39_v19 = vadd.f32 %v38_v16, %v31_v17 }
  0x84   :  { %v47_v21 = vadd.f32 %v46_v18, %v39_v19 }
  0x86   :  { %v53_v22 = vadd.f32 %v51_v20, %v47_v21 }
  0x88   :  { %v63_v23 = vadd.f32 -0.25, %v53_v22  ;;  %56 = vst [vmem:[%s132_s3] sm:$0xff] %v53_v22 }
  0x8a   :  { %v55_v24 = vmax.f32 %v63_v23, 0.0  ;;  %57 = vst [vmem:[%s132_s3 + $0x8] sm:$0xff] %v63_v23 }
  0x8c   :  { %58 = vst [vmem:[%s132_s3 + $0x10] sm:$0xff] %v55_v24 }

</bundles_post_ra>
